<compile_context>
chip_gen: v7x
topology: tpu7x:2x2x1
jax: 0.10.0
libtpu: 0.0.40
codegen_flags: <defaults>
</compile_context>

<pallas_src>
import functools
import math

import jax
import jax.numpy as jnp
from jax import lax
from jax.experimental import pallas as pl
from jax.experimental.pallas import tpu as pltpu


# ----------------------------------------------------------------------------
# pltpu.roll direction probe (tiny one-time kernel).  The conv needs
# rolled[p] == x[(p + off) mod L]; probe which static shift sign delivers that
# so the main kernel is correct under either rotate convention.
# ----------------------------------------------------------------------------
_ROLL_MATCHES_JNP = None


def _roll_matches_jnp_convention() -> bool:
    global _ROLL_MATCHES_JNP
    if _ROLL_MATCHES_JNP is None:
        def probe(x_ref, o_ref):
            o_ref[...] = pltpu.roll(x_ref[...], 1, axis=1)

        x = jnp.tile(jnp.arange(128, dtype=jnp.float32)[None, :], (8, 1))
        y = pl.pallas_call(
            probe, out_shape=jax.ShapeDtypeStruct((8, 128), jnp.float32))(x)
        # jnp.roll convention: result[:, 0] == x[:, -1] == 127
        _ROLL_MATCHES_JNP = bool(jax.device_get(y)[0, 0] == 127.0)
    return _ROLL_MATCHES_JNP


def _tap_shifts(tl: int, w: int):
    """Static lane-roll amounts for the 9 conv taps (dy, dx in {-1,0,1})."""
    jnp_conv = _roll_matches_jnp_convention()
    taps = []
    for dy in (-1, 0, 1):
        for dx in (-1, 0, 1):
            off = dy * w + dx                    # rolled[p] must equal x[p + off]
            shift = (-off) % tl if jnp_conv else off % tl
            taps.append((off, shift))
    return tuple(taps)


def _tap_masks(nb: int, h: int, w: int) -> jnp.ndarray:
    """(9, nb*h*w) masks: zero where a tap would cross an image border (zero pad)."""
    yy, xx = jnp.meshgrid(jnp.arange(h), jnp.arange(w), indexing="ij")
    rows = []
    for dy in (-1, 0, 1):
        for dx in (-1, 0, 1):
            ok = ((yy + dy >= 0) & (yy + dy < h) & (xx + dx >= 0) & (xx + dx < w))
            rows.append(jnp.tile(ok.reshape(1, h * w), (1, nb)))
    return jnp.concatenate(rows, axis=0).astype(jnp.float32)


# ----------------------------------------------------------------------------
# Fused kernel: 1x1 convs -> 3x3 conv (as masked rolls) -> gating.
# All activation refs are (C, TL) with TL = block_images * H * W on lanes.
# ----------------------------------------------------------------------------
def _sensory_update_kernel(g16_ref, g8_ref, g4_ref, h_ref, mask_ref,
                           w16_ref, w8_ref, w4_ref, b1_ref, wt_ref, bt_ref,
                           o_ref, *, S, taps, compute_dtype):
    f32 = jnp.float32

    # --- fused 1x1 convs: mid = W16 @ g16 + W8 @ g8d + W4 @ g4d + b ---
    mid = jnp.dot(w16_ref[...], g16_ref[...], preferred_element_type=f32)
    mid = mid + jnp.dot(w8_ref[...], g8_ref[...], preferred_element_type=f32)
    mid = mid + jnp.dot(w4_ref[...], g4_ref[...], preferred_element_type=f32)
    mid = mid + b1_ref[...]                                  # (mid_dim, TL)

    h = h_ref[...].astype(f32)                               # f32 for gating math
    x = jnp.concatenate([mid, h], axis=0).astype(compute_dtype)   # (Cin, TL)
    mask = mask_ref[...]                                     # (9, TL)

    # --- 3x3 conv (padding=1) as 9 masked lane-rolls + MXU contractions ---
    tl = x.shape[1]
    acc = jnp.zeros((3 * S, tl), f32)
    for t, (off, shift) in enumerate(taps):
        if off == 0:
            xs = x                                           # center tap, always valid
        else:
            xs = pltpu.roll(x, shift, axis=1) * mask[t:t + 1, :]
        acc = acc + jnp.dot(wt_ref[t], xs, preferred_element_type=f32)
    vals = acc + bt_ref[...]                                 # (3S, TL)

    # --- gating (f32, lane-dense) ---
    forget_gate = jax.nn.sigmoid(vals[:S])
    update_gate = jax.nn.sigmoid(vals[S:2 * S])
    new_value = jnp.tanh(vals[2 * S:])
    new_h = forget_gate * h * (1.0 - update_gate) + update_gate * new_value
    o_ref[...] = new_h.astype(o_ref.dtype)


# ----------------------------------------------------------------------------
# Wrapper: layout plumbing (XLA) + block-size selection + pallas_call.
# ----------------------------------------------------------------------------
def _to_cl(x5d):
    # (B, O, C, H, W) -> (C, B*O*H*W): channels on sublanes, spatial on lanes.
    B, O, C, H, W = x5d.shape
    return jnp.transpose(x5d, (2, 0, 1, 3, 4)).reshape(C, B * O * H * W)


def _area_down(x5d, k):
    # k x k average pooling == F.interpolate(mode='area', scale_factor=1/k).
    B, O, C, KH, KW = x5d.shape
    return x5d.reshape(B, O, C, KH // k, k, KW // k, k).mean(axis=(4, 6))


def _pick_block_images(n, h, w, per_image_bytes, vmem_budget=8 << 20):
    # Whole images per grid step so rolls/masks never cross a block boundary.
    # Biggest block under the budget, preferring >=2 steps (v7x megacore).
    if n == 1 or (h * w) % 128 != 0:
        # TODO(synk): images whose H*W is not a multiple of 128 fall back to a
        # single block (== full array, always BlockSpec-legal); very large such
        # images would need haloed row tiles instead.
        return n
    divisors = [d for d in range(1, n + 1) if n % d == 0]
    fitting = [d for d in divisors if 2 * d * per_image_bytes <= vmem_budget] or [1]
    multi = [d for d in fitting if n // d >= 2]
    return max(multi) if multi else max(fitting)


def sensory_updater_forward(params, g0, g1, g2, h, *, sensory_dim,
                            block_images=None, compute_dtype=jnp.float32):
    """new_h = SensoryUpdater([g0, g1, g2], h); tensors in (B, O, C, H, W)."""
    B, O, C0, H, W = g0.shape
    N, S = B * O, sensory_dim
    L = N * H * W
    mid_dim = params["w16"].shape[0]
    cin = mid_dim + S

    # Layout plumbing + area downsample (XLA): everything becomes (C, N*H*W).
    g16 = _to_cl(g0)
    g8d = _to_cl(_area_down(g1, 2))
    g4d = _to_cl(_area_down(g2, 4))
    hcl = _to_cl(h)
    C1, C2 = g8d.shape[0], g4d.shape[0]

    if block_images is None:
        per_img = H * W * 4 * (C0 + C1 + C2 + S + 2 * cin + 3 * S + 9 + S)
        block_images = _pick_block_images(N, H, W, per_img)
    nb = block_images
    tl = nb * H * W
    assert L % tl == 0
    grid = (L // tl,)

    taps = _tap_shifts(tl, W)
    masks = _tap_masks(nb, H, W).astype(compute_dtype)
    b1 = params["b16"] + params["b8"] + params["b4"]          # (mid_dim, 1)

    cast = lambda a: a.astype(compute_dtype)
    g16, g8d, g4d = cast(g16), cast(g8d), cast(g4d)
    w16, w8, w4, wt = (cast(params["w16"]), cast(params["w8"]),
                       cast(params["w4"]), cast(params["wt"]))
    bt = params["bt"]

    rep2 = lambda i: (0, 0)
    blk = lambda c: pl.BlockSpec((c, tl), lambda i: (0, i))

    out = pl.pallas_call(
        functools.partial(_sensory_update_kernel, S=S, taps=taps,
                          compute_dtype=compute_dtype),
        out_shape=jax.ShapeDtypeStruct((S, L), h.dtype),
        grid=grid,
        in_specs=[
            blk(C0), blk(C1), blk(C2), blk(S),                 # activations
            pl.BlockSpec((9, tl), lambda i: (0, 0)),           # border masks
            pl.BlockSpec(w16.shape, rep2),
            pl.BlockSpec(w8.shape, rep2),
            pl.BlockSpec(w4.shape, rep2),
            pl.BlockSpec(b1.shape, rep2),
            pl.BlockSpec(wt.shape, lambda i: (0, 0, 0)),
            pl.BlockSpec(bt.shape, rep2),
        ],
        out_specs=pl.BlockSpec((S, tl), lambda i: (0, i)),
        compiler_params=pltpu.CompilerParams(
            dimension_semantics=("parallel",),
            vmem_limit_bytes=32 * 1024 * 1024),
    )(g16, g8d, g4d, hcl, masks, w16, w8, w4, b1, wt, bt)

    # back to PyTorch layout (B, O, S, H, W)
    return jnp.transpose(out.reshape(S, B, O, H, W), (1, 2, 0, 3, 4))


# ----------------------------------------------------------------------------
# Parameters (PyTorch-style inits, stored in kernel-friendly shapes).
# ----------------------------------------------------------------------------
def init_params(key, g_dims, mid_dim, sensory_dim):
    ks = jax.random.split(key, 8)

    def conv1x1(kw, kb, c_in, c_out):
        bound = 1.0 / math.sqrt(c_in)
        w = jax.random.uniform(kw, (c_out, c_in), jnp.float32, -bound, bound)
        b = jax.random.uniform(kb, (c_out, 1), jnp.float32, -bound, bound)
        return w, b

    w16, b16 = conv1x1(ks[0], ks[1], g_dims[0], mid_dim)
    w8, b8 = conv1x1(ks[2], ks[3], g_dims[1], mid_dim)
    w4, b4 = conv1x1(ks[4], ks[5], g_dims[2], mid_dim)

    cin_t = mid_dim + sensory_dim
    cout_t = 3 * sensory_dim
    # xavier_normal_: std = sqrt(2 / (fan_in + fan_out)), fans include the 3x3 taps
    std = math.sqrt(2.0 / (9 * cin_t + 9 * cout_t))
    wt = jax.random.normal(ks[6], (9, cout_t, cin_t), jnp.float32) * std
    bound_t = 1.0 / math.sqrt(9 * cin_t)
    bt = jax.random.uniform(ks[7], (cout_t, 1), jnp.float32, -bound_t, bound_t)

    return dict(w16=w16, b16=b16, w8=w8, b8=b8, w4=w4, b4=b4, wt=wt, bt=bt)


# ----------------------------------------------------------------------------
# Pure-JAX reference (lax.conv, HIGHEST precision) for correctness checking.
# ----------------------------------------------------------------------------
def reference_forward(params, g0, g1, g2, h, *, sensory_dim):
    B, O, _, H, W = g0.shape
    S = sensory_dim
    dn = ("NCHW", "OIHW", "NCHW")
    hp = lax.Precision.HIGHEST

    def flat(x5):
        return x5.reshape(B * O, *x5.shape[2:])

    def conv1x1(x, w, b):
        y = lax.conv_general_dilated(x, w[:, :, None, None], (1, 1), "VALID",
                                     dimension_numbers=dn, precision=hp)
        return y + b.reshape(1, -1, 1, 1)

    g16, hn = flat(g0), flat(h)
    g8d, g4d = flat(_area_down(g1, 2)), flat(_area_down(g2, 4))

    mid = (conv1x1(g16, params["w16"], params["b16"])
           + conv1x1(g8d, params["w8"], params["b8"])
           + conv1x1(g4d, params["w4"], params["b4"]))

    x = jnp.concatenate([mid, hn], axis=1)
    cout_t, cin_t = params["wt"].shape[1], params["wt"].shape[2]
    w_oihw = jnp.transpose(params["wt"].reshape(3, 3, cout_t, cin_t), (2, 3, 0, 1))
    vals = lax.conv_general_dilated(x, w_oihw, (1, 1), "SAME",
                                    dimension_numbers=dn, precision=hp)
    vals = vals + params["bt"].reshape(1, -1, 1, 1)

    fg = jax.nn.sigmoid(vals[:, :S])
    ug = jax.nn.sigmoid(vals[:, S:2 * S])
    nv = jnp.tanh(vals[:, 2 * S:])
    new_h = fg * hn * (1.0 - ug) + ug * nv
    return new_h.reshape(B, O, S, H, W)


if __name__ == "__main__":
    g_dims = [32, 16, 8]
    mid_dim = 32
    sensory_dim = 16
    B, O, H, W = 2, 2, 16, 16   # H*W = 256 -> lane-dense blocks, 2 parallel steps

    key = jax.random.PRNGKey(0)
    kp, k0, k1, k2, kh = jax.random.split(key, 5)
    params = init_params(kp, g_dims, mid_dim, sensory_dim)

    g0 = jax.random.normal(k0, (B, O, g_dims[0], H, W), jnp.float32)
    g1 = jax.random.normal(k1, (B, O, g_dims[1], 2 * H, 2 * W), jnp.float32)
    g2 = jax.random.normal(k2, (B, O, g_dims[2], 4 * H, 4 * W), jnp.float32)
    h = jax.random.normal(kh, (B, O, sensory_dim, H, W), jnp.float32)

    out = sensory_updater_forward(params, g0, g1, g2, h, sensory_dim=sensory_dim)
    out = jax.block_until_ready(out)

    ref = jax.block_until_ready(
        reference_forward(params, g0, g1, g2, h, sensory_dim=sensory_dim))

    assert out.shape == (B, O, sensory_dim, H, W)
    err = float(jnp.max(jnp.abs(out - ref)))
    assert err < 5e-4, err
    print("KERNEL_OK")
</pallas_src>

<mosaic_0001>
module attributes {stable_mosaic.version = 11 : i64} {
  func.func @probe(%arg0: memref<8x128xf32, #tpu.memory_space<vmem>>, %arg1: memref<8x128xf32, #tpu.memory_space<vmem>>) attributes {dimension_semantics = [], scalar_prefetch = 0 : i64, scratch_operands = 0 : i64, tpu.core_type = #tpu.core_type<tc>} {
    %c0 = arith.constant 0 : index
    %c0_0 = arith.constant 0 : index
    %0 = vector.load %arg0[%c0, %c0_0] : memref<8x128xf32, #tpu.memory_space<vmem>>, vector<8x128xf32>
    %c1_i32 = arith.constant 1 : i32
    %1 = tpu.dynamic_rotate %0 by %c1_i32 dim 1 : vector<8x128xf32>, i32 -> vector<8x128xf32>
    %c0_1 = arith.constant 0 : index
    %c0_2 = arith.constant 0 : index
    %2 = vector.load %arg1[%c0_1, %c0_2] : memref<8x128xf32, #tpu.memory_space<vmem>>, vector<8x128xf32>
    tpu.vector_store %arg1[%c0_1, %c0_2], %1 {strides = array<i32>} : memref<8x128xf32, #tpu.memory_space<vmem>>, vector<8x128xf32>,
    return
  }
}

</mosaic_0001>

<bundles_post_ra>
// kernel: tpu_custom_call.1
= control target key start
LH: loop header
LB: loop body
LE: loop exit
PB: predicated region body
PF: predicated region fallthrough
CT: control target
= control target key end

     0   :  { %6 = vsyncpa [#allocation3], 0  ;;  %s128_s0 = inlined_call_operand.hbm [shape: f32[8,128], index: 0, kind: input, shape index: {}]   ;;  %s129_s1 = inlined_call_operand.hbm [shape: f32[8,128], index: 1, kind: output, shape index: {}]  }
   0x1   :  { %7 = vsyncpa [#allocation4], 0  ;;  %s91_s6 = smov [#allocation2]   ;;  %s43_s10 = scalar_lea.hbm %s128_s0, 128 }
   0x2   :  { %s14_s7 = sshll.u32 %s91_s6, 4  ;;  %p44_p0 = scmp.ne.s32.totalorder %s128_s0, %s43_s10  ;;  %s15_s7 = int_to_ptr.vmem [resolvable:$true] %s14_s7 }
   0x3   :  { %p47_p1 = scmp.lt.u32.totalorder %s43_s10, %s128_s0 }
   0x5   :  { %p49_p2 = pnand %p47_p1, %p44_p0 }
   0x7   :  { %52 = shalt.err (!%p49_p2)
}
   0x8   :  { %s53_s15 = scalar_lea.vmem %s15_s7, 128  ;;  %p58_p4 = scmp.lt.s32.totalorder %s15_s7, %s15_s7 }
   0x9   :  { %p54_p3 = scmp.ne.s32.totalorder %s15_s7, %s53_s15  ;;  %p59_p5 = scmp.lt.s32.totalorder %s53_s15, %s53_s15 }
   0xb   :  { %p60_p6 = por %p59_p5, %p58_p4 }
   0xd   :  { %p61_p7 = pnand %p60_p6, %p54_p3 }
   0xf   :  { %64 = shalt.err (!%p61_p7)
}
  0x10   :  { %17 = dma.hbm_to_vmem [thread:$0]  %s128_s0, 128, %s15_s7, [#allocation3]  }
  0x11   :  { %87 = dma.done.wait [#allocation3], 128  }
  0x12   :  { %88 = vsyncadd [#allocation3], 4294967168  ;;  %v21_v0 = vld [vmem:[#allocation2] sm:$0xff]  ;;  %s92_s18 = smov 1   ;;  %s93_s19 = smov [#allocation5]  }
  0x13   :  { %22 = vrot.lane.b32.xlu0 %v21_v0, %s92_s18  ;;  %s31_s20 = sshll.u32 %s93_s19, 4  ;;  %s32_s20 = int_to_ptr.vmem [resolvable:$true] %s31_s20 }
  0x14   :  { %s65_s21 = scalar_lea.vmem %s32_s20, 128  ;;  %p70_p9 = scmp.lt.s32.totalorder %s32_s20, %s32_s20 }
  0x15   :  { %p66_p8 = scmp.ne.s32.totalorder %s32_s20, %s65_s21  ;;  %p71_p10 = scmp.lt.s32.totalorder %s65_s21, %s65_s21 }
  0x17   :  { %p72_p11 = por %p71_p10, %p70_p9 }
  0x19   :  { %p73_p12 = pnand %p72_p11, %p66_p8 }
  0x85   :  { %v23_v1 = vpop.permute.xlu0 %22 }
  0x86   :  { %24 = vst [vmem:[#allocation5] sm:$0xff] %v23_v1 }
  0x87   :  { %76 = shalt.err (!%p73_p12)
}
  0x88   :  { %s77_s0 = scalar_lea.hbm %s129_s1, 128 }
  0x89   :  { %p78_p13 = scmp.ne.s32.totalorder %s129_s1, %s77_s0  ;;  %p81_p0 = scmp.lt.u32.totalorder %s77_s0, %s129_s1 }
  0x8b   :  { %p83_p1 = pnand %p81_p0, %p78_p13 }
  0x8d   :  { %86 = shalt.err (!%p83_p1)
}
  0x8e   :  { %34 = dma.vmem_to_hbm [thread:$0]  %s32_s20, 128, %s129_s1, [#allocation4]  }
  0x8f   :  { %89 = dma.done.wait [#allocation4], 128  }
  0x90   :  { %90 = vsyncadd [#allocation4], 4294967168 }
  0x91   :  { %38 = vsyncpa [#allocation3], 1 }
  0x92   :  { %39 = vsyncpa [#allocation4], 1 }

</bundles_post_ra>
